<compile_context>
chip_gen: v5e
topology: v5e:2x2
jax: 0.10.0
libtpu: 0.0.40
codegen_flags: <defaults>
</compile_context>

<pallas_src>
import jax
import jax.numpy as jnp
from jax.experimental import pallas as pl
from jax.experimental.pallas import tpu as pltpu


def _ab_mlp_kernel(xT_ref, w1_ref, b1_ref, w2_ref, b2_ref, w3_ref, b3_ref,
                   o_ref):
    """Fused MLP in transposed (batch-on-lanes) layout.

    xT_ref : (D0, tile_b)   input tile, batch on the 128-wide lane axis
    wN_ref : (out, in)      torch-layout weights (resident across the grid)
    bN_ref : (out, 1)       biases as columns (broadcast over lanes)
    o_ref  : (4, tile_b)    lane-dense output tile
    Normalization is pre-folded into (w1, b1) by fold_normalization().
    """
    xT = xT_ref[...]

    # hidden layer 1: Linear + ReLU  -> (D1, tile_b)
    h1 = jnp.dot(w1_ref[...], xT, preferred_element_type=jnp.float32) + b1_ref[...]
    h1 = jnp.maximum(h1, 0.0)

    # hidden layer 2: Linear + ReLU  -> (D2, tile_b)
    h2 = jnp.dot(w2_ref[...], h1, preferred_element_type=jnp.float32) + b2_ref[...]
    h2 = jnp.maximum(h2, 0.0)

    # output layer: Linear(-> 4) + Sigmoid  -> (4, tile_b), lane-dense store
    logits = jnp.dot(w3_ref[...], h2, preferred_element_type=jnp.float32) + b3_ref[...]
    o_ref[...] = jax.nn.sigmoid(logits)


def _round_up(a, m):
    return ((a + m - 1) // m) * m


def _cdiv(a, b):
    return (a + b - 1) // b


def fold_normalization(params, mu=0.0, sigma=1.0):
    """Fold (x - mu)/sigma into layer 1.  Call ONCE per parameter set.

    Supports scalar or per-feature (length-D0) mu/sigma:
        W1' = W1 / sigma   (per input column),   b1' = b1 - W1 @ (mu/sigma)
    """
    w1, b1, w2, b2, w3, b3 = params
    d_in = w1.shape[1]
    mu = jnp.broadcast_to(jnp.asarray(mu, jnp.float32), (d_in,))
    sigma = jnp.broadcast_to(jnp.asarray(sigma, jnp.float32), (d_in,))
    w1f = (w1 / sigma[None, :]).astype(jnp.float32)
    b1f = (b1 - (w1 @ (mu / sigma))[:, None]).astype(jnp.float32)
    return (w1f, b1f, w2, b2, w3, b3)


def ab_model_forward(x, folded_params, *, tile_b=2048):
    """Pallas ABModel.forward.  `folded_params` come from fold_normalization().

    params layout (torch-style): wN (out, in) f32, bN (out, 1) f32.
    x: (B, D0) f32.  Returns (B, 4) f32.
    """
    w1, b1, w2, b2, w3, b3 = folded_params
    B, D0 = x.shape
    D1 = w1.shape[0]
    D2 = w2.shape[0]
    DO = w3.shape[0]  # always 4

    # ---- batch tiling (batch lives on the 128-wide lane axis) -------------
    b128 = _round_up(max(B, 1), 128)
    tile_b = max(128, _round_up(int(tile_b), 128))
    # prefer >= 2 grid steps so a v7x chip can use both TensorCores
    tile_b = min(tile_b, max(128, _round_up(_cdiv(b128, 2), 128)))
    n_steps = _cdiv(b128, tile_b)
    # even out tiles -> minimal padding in the last grid step
    tile_b = _round_up(_cdiv(b128, n_steps), 128)
    b_pad = n_steps * tile_b

    # one-time wrapper-side pad + transpose: (B, D0) -> (D0, b_pad)
    xT = jnp.pad(x.astype(jnp.float32), ((0, b_pad - B), (0, 0))).T

    grid_spec = pl.GridSpec(
        grid=(n_steps,),
        in_specs=[
            pl.BlockSpec((D0, tile_b), lambda i: (0, i)),   # x^T tile (lane-dense)
            pl.BlockSpec((D1, D0), lambda i: (0, 0)),        # w1 (resident)
            pl.BlockSpec((D1, 1), lambda i: (0, 0)),         # b1
            pl.BlockSpec((D2, D1), lambda i: (0, 0)),        # w2
            pl.BlockSpec((D2, 1), lambda i: (0, 0)),         # b2
            pl.BlockSpec((DO, D2), lambda i: (0, 0)),        # w3
            pl.BlockSpec((DO, 1), lambda i: (0, 0)),         # b3
        ],
        out_specs=pl.BlockSpec((DO, tile_b), lambda i: (0, i)),
    )

    flops = 2 * b_pad * (D0 * D1 + D1 * D2 + D2 * DO)
    bytes_accessed = 4 * (b_pad * D0                      # x stream
                          + D1 * D0 + D1                  # layer 1 (once)
                          + D2 * D1 + D2                  # layer 2 (once)
                          + DO * D2 + DO                  # layer 3 (once)
                          + b_pad * DO)                   # output stream
    cost = pl.CostEstimate(flops=flops,
                           transcendentals=b_pad * DO,    # sigmoid exp
                           bytes_accessed=bytes_accessed)

    outT = pl.pallas_call(
        _ab_mlp_kernel,
        out_shape=jax.ShapeDtypeStruct((DO, b_pad), jnp.float32),
        grid_spec=grid_spec,
        compiler_params=pltpu.CompilerParams(
            dimension_semantics=("parallel",)),
        cost_estimate=cost,
    )(xT, w1, b1, w2, b2, w3, b3)

    # (DO, b_pad) -> (B, DO); pad columns are sliced off after the transpose
    return outT.T[:B]


def init_params(key, hidden_layer_size):
    """Deterministic init matching ABModel(*hidden_layer_size) layer shapes.

    hidden_layer_size = (D0, D1, D2) -> Linear(D0,D1), Linear(D1,D2), Linear(D2,4).
    Weights stored torch-style as (out_features, in_features); biases (out, 1).
    """
    dims = list(hidden_layer_size) + [4]
    params = []
    for i in range(len(dims) - 1):
        d_in, d_out = dims[i], dims[i + 1]
        key, wk, bk = jax.random.split(key, 3)
        bound = 1.0 / jnp.sqrt(d_in)  # torch default uniform(-1/sqrt(in), 1/sqrt(in))
        w = jax.random.uniform(wk, (d_out, d_in), jnp.float32, -bound, bound)
        b = jax.random.uniform(bk, (d_out, 1), jnp.float32, -bound, bound)
        params += [w, b]
    return tuple(params)


def reference_forward(x, params, mu, sigma):
    w1, b1, w2, b2, w3, b3 = params
    h = (x - mu) / sigma
    h = jnp.maximum(h @ w1.T + b1[:, 0], 0.0)
    h = jnp.maximum(h @ w2.T + b2[:, 0], 0.0)
    return jax.nn.sigmoid(h @ w3.T + b3[:, 0])


if __name__ == "__main__":
    key = jax.random.PRNGKey(0)

    # ABModel(32, 64, 32, mu=0.5, sigma=2.0)
    hidden_layer_size = (32, 64, 32)
    mu, sigma = 0.5, 2.0

    key, pkey, xkey1, xkey2, mkey, skey = jax.random.split(key, 6)
    params = init_params(pkey, hidden_layer_size)

    # Fold normalization once (hoisted out of the per-call path).
    folded = fold_normalization(params, mu=mu, sigma=sigma)

    # --- test 1: small batch (1-step grid, padding path) --------------------
    B1 = 16
    x1 = jax.random.normal(xkey1, (B1, hidden_layer_size[0]), jnp.float32)
    out1 = jax.block_until_ready(ab_model_forward(x1, folded))
    ref1 = reference_forward(x1, params, mu, sigma)
    assert out1.shape == (B1, 4)
    assert jnp.allclose(out1, ref1, atol=1e-5, rtol=1e-5), "mismatch (scalar norm)"

    # --- test 2: larger batch -> multi-step parallel grid --------------------
    B2 = 300
    x2 = jax.random.normal(xkey2, (B2, hidden_layer_size[0]), jnp.float32)
    out2 = jax.block_until_ready(ab_model_forward(x2, folded))
    ref2 = reference_forward(x2, params, mu, sigma)
    assert out2.shape == (B2, 4)
    assert jnp.allclose(out2, ref2, atol=1e-5, rtol=1e-5), "mismatch (multi-tile)"

    # --- test 3: per-feature mu/sigma vectors (correctness-concern check) ----
    mu_v = jax.random.normal(mkey, (hidden_layer_size[0],), jnp.float32)
    sigma_v = 1.0 + jax.nn.softplus(
        jax.random.normal(skey, (hidden_layer_size[0],), jnp.float32))
    folded_v = fold_normalization(params, mu=mu_v, sigma=sigma_v)
    out3 = jax.block_until_ready(ab_model_forward(x1, folded_v))
    ref3 = reference_forward(x1, params, mu_v, sigma_v)
    assert jnp.allclose(out3, ref3, atol=1e-5, rtol=1e-5), "mismatch (vector norm)"

    print("KERNEL_OK")
</pallas_src>

<mosaic_0001>
module attributes {stable_mosaic.version = 11 : i64} {
  func.func @_ab_mlp_kernel(%arg0: i32, %arg1: memref<32x128xf32, #tpu.memory_space<vmem>>, %arg2: memref<64x32xf32, #tpu.memory_space<vmem>>, %arg3: memref<64x1xf32, #tpu.memory_space<vmem>>, %arg4: memref<32x64xf32, #tpu.memory_space<vmem>>, %arg5: memref<32x1xf32, #tpu.memory_space<vmem>>, %arg6: memref<4x32xf32, #tpu.memory_space<vmem>>, %arg7: memref<4x1xf32, #tpu.memory_space<vmem>>, %arg8: memref<4x128xf32, #tpu.memory_space<vmem>>) attributes {dimension_semantics = [#tpu.dimension_semantics<parallel>], iteration_bounds = array<i64: 1>, scalar_prefetch = 0 : i64, scratch_operands = 0 : i64, tpu.core_type = #tpu.core_type<tc>, window_params = [{transform_indices = @transform_0, window_bounds = array<i64: 32, 128>}, {pipeline_mode = #tpu.pipeline_mode<synchronous>, transform_indices = @transform_1, window_bounds = array<i64: 64, 32>}, {pipeline_mode = #tpu.pipeline_mode<synchronous>, transform_indices = @transform_2, window_bounds = array<i64: 64, 1>}, {pipeline_mode = #tpu.pipeline_mode<synchronous>, transform_indices = @transform_3, window_bounds = array<i64: 32, 64>}, {pipeline_mode = #tpu.pipeline_mode<synchronous>, transform_indices = @transform_4, window_bounds = array<i64: 32, 1>}, {pipeline_mode = #tpu.pipeline_mode<synchronous>, transform_indices = @transform_5, window_bounds = array<i64: 4, 32>}, {pipeline_mode = #tpu.pipeline_mode<synchronous>, transform_indices = @transform_6, window_bounds = array<i64: 4, 1>}, {transform_indices = @transform_7, window_bounds = array<i64: 4, 128>}]} {
    %c0 = arith.constant 0 : index
    %c0_0 = arith.constant 0 : index
    %0 = vector.load %arg1[%c0, %c0_0] : memref<32x128xf32, #tpu.memory_space<vmem>>, vector<32x128xf32>
    %c0_1 = arith.constant 0 : index
    %c0_2 = arith.constant 0 : index
    %1 = vector.load %arg2[%c0_1, %c0_2] : memref<64x32xf32, #tpu.memory_space<vmem>>, vector<64x32xf32>
    %cst = arith.constant dense<0.000000e+00> : vector<64x128xf32>
    %2 = tpu.matmul %1, %0, %cst {dimension_numbers = #tpu.dot_dimension_numbers<[1], [0], [0], [1], [0, 0, 1, 1], [], []>} : vector<64x32xf32>, vector<32x128xf32>, vector<64x128xf32> -> vector<64x128xf32>
    %c0_3 = arith.constant 0 : index
    %c0_4 = arith.constant 0 : index
    %3 = vector.load %arg3[%c0_3, %c0_4] : memref<64x1xf32, #tpu.memory_space<vmem>>, vector<64x1xf32>
    %4 = vector.broadcast %3 : vector<64x1xf32> to vector<64x128xf32>
    %5 = arith.addf %2, %4 : vector<64x128xf32>
    %cst_5 = arith.constant 0.000000e+00 : f32
    %6 = vector.broadcast %cst_5 : f32 to vector<64x128xf32>
    %7 = arith.maximumf %5, %6 : vector<64x128xf32>
    %c0_6 = arith.constant 0 : index
    %c0_7 = arith.constant 0 : index
    %8 = vector.load %arg4[%c0_6, %c0_7] : memref<32x64xf32, #tpu.memory_space<vmem>>, vector<32x64xf32>
    %cst_8 = arith.constant dense<0.000000e+00> : vector<32x128xf32>
    %9 = tpu.matmul %8, %7, %cst_8 {dimension_numbers = #tpu.dot_dimension_numbers<[1], [0], [0], [1], [0, 0, 1, 1], [], []>} : vector<32x64xf32>, vector<64x128xf32>, vector<32x128xf32> -> vector<32x128xf32>
    %c0_9 = arith.constant 0 : index
    %c0_10 = arith.constant 0 : index
    %10 = vector.load %arg5[%c0_9, %c0_10] : memref<32x1xf32, #tpu.memory_space<vmem>>, vector<32x1xf32>
    %11 = vector.broadcast %10 : vector<32x1xf32> to vector<32x128xf32>
    %12 = arith.addf %9, %11 : vector<32x128xf32>
    %cst_11 = arith.constant 0.000000e+00 : f32
    %13 = vector.broadcast %cst_11 : f32 to vector<32x128xf32>
    %14 = arith.maximumf %12, %13 : vector<32x128xf32>
    %c0_12 = arith.constant 0 : index
    %c0_13 = arith.constant 0 : index
    %15 = vector.load %arg6[%c0_12, %c0_13] : memref<4x32xf32, #tpu.memory_space<vmem>>, vector<4x32xf32>
    %cst_14 = arith.constant dense<0.000000e+00> : vector<4x128xf32>
    %16 = tpu.matmul %15, %14, %cst_14 {dimension_numbers = #tpu.dot_dimension_numbers<[1], [0], [0], [1], [0, 0, 1, 1], [], []>} : vector<4x32xf32>, vector<32x128xf32>, vector<4x128xf32> -> vector<4x128xf32>
    %c0_15 = arith.constant 0 : index
    %c0_16 = arith.constant 0 : index
    %17 = vector.load %arg7[%c0_15, %c0_16] : memref<4x1xf32, #tpu.memory_space<vmem>>, vector<4x1xf32>
    %18 = vector.broadcast %17 : vector<4x1xf32> to vector<4x128xf32>
    %19 = arith.addf %16, %18 : vector<4x128xf32>
    %20 = arith.negf %19 : vector<4x128xf32>
    %21 = math.exp %20 : vector<4x128xf32>
    %cst_17 = arith.constant 1.000000e+00 : f32
    %22 = vector.broadcast %cst_17 : f32 to vector<4x128xf32>
    %23 = arith.addf %22, %21 : vector<4x128xf32>
    %24 = arith.divf %22, %23 : vector<4x128xf32>
    %c0_18 = arith.constant 0 : index
    %c0_19 = arith.constant 0 : index
    %25 = vector.load %arg8[%c0_18, %c0_19] : memref<4x128xf32, #tpu.memory_space<vmem>>, vector<4x128xf32>
    tpu.vector_store %arg8[%c0_18, %c0_19], %24 {strides = array<i32>} : memref<4x128xf32, #tpu.memory_space<vmem>>, vector<4x128xf32>,
    return
  }
  func.func @transform_0(%arg0: i32) -> (i32, i32) {
    %c0_i32 = arith.constant 0 : i32
    %c0_i32_0 = arith.constant 0 : i32
    return %c0_i32, %arg0 : i32, i32
  }
  func.func @transform_1(%arg0: i32) -> (i32, i32) {
    %c0_i32 = arith.constant 0 : i32
    %c0_i32_0 = arith.constant 0 : i32
    %c0_i32_1 = arith.constant 0 : i32
    return %c0_i32, %c0_i32_0 : i32, i32
  }
  func.func @transform_2(%arg0: i32) -> (i32, i32) {
    %c0_i32 = arith.constant 0 : i32
    %c0_i32_0 = arith.constant 0 : i32
    %c0_i32_1 = arith.constant 0 : i32
    return %c0_i32, %c0_i32_0 : i32, i32
  }
  func.func @transform_3(%arg0: i32) -> (i32, i32) {
    %c0_i32 = arith.constant 0 : i32
    %c0_i32_0 = arith.constant 0 : i32
    %c0_i32_1 = arith.constant 0 : i32
    return %c0_i32, %c0_i32_0 : i32, i32
  }
  func.func @transform_4(%arg0: i32) -> (i32, i32) {
    %c0_i32 = arith.constant 0 : i32
    %c0_i32_0 = arith.constant 0 : i32
    %c0_i32_1 = arith.constant 0 : i32
    return %c0_i32, %c0_i32_0 : i32, i32
  }
  func.func @transform_5(%arg0: i32) -> (i32, i32) {
    %c0_i32 = arith.constant 0 : i32
    %c0_i32_0 = arith.constant 0 : i32
    %c0_i32_1 = arith.constant 0 : i32
    return %c0_i32, %c0_i32_0 : i32, i32
  }
  func.func @transform_6(%arg0: i32) -> (i32, i32) {
    %c0_i32 = arith.constant 0 : i32
    %c0_i32_0 = arith.constant 0 : i32
    %c0_i32_1 = arith.constant 0 : i32
    return %c0_i32, %c0_i32_0 : i32, i32
  }
  func.func @transform_7(%arg0: i32) -> (i32, i32) {
    %c0_i32 = arith.constant 0 : i32
    %c0_i32_0 = arith.constant 0 : i32
    return %c0_i32, %arg0 : i32, i32
  }
}

</mosaic_0001>

<bundles_post_ra>
// kernel: tpu_custom_call.1
= control target key start
LH: loop header
LB: loop body
LE: loop exit
PB: predicated region body
PF: predicated region fallthrough
CT: control target
= control target key end

     0   :  { %v362_v4 = vmov 0   ;;  %vm87_vm0 = vcmask 261120   ;;  %s506_s0 = inlined_call_operand.vmem [shape: f32[32,128], index: 0, kind: input, shape index: {}]   ;;  %s507_s1 = inlined_call_operand.vmem [shape: f32[64,32], index: 1, kind: input, shape index: {}]   ;;  %s508_s2 = inlined_call_operand.vmem [shape: f32[64,1], index: 2, kind: input, shape index: {}]   ;;  %s509_s3 = inlined_call_operand.vmem [shape: f32[32,64], index: 3, kind: input, shape index: {}]   ;;  %s510_s4 = inlined_call_operand.vmem [shape: f32[32,1], index: 4, kind: input, shape index: {}]   ;;  %s511_s5 = inlined_call_operand.vmem [shape: f32[4,32], index: 5, kind: input, shape index: {}]   ;;  %s512_s6 = inlined_call_operand.vmem [shape: f32[4,1], index: 6, kind: input, shape index: {}]   ;;  %s513_s7 = inlined_call_operand.hbm [shape: f32[4,128], index: 7, kind: output, shape index: {}]  }
   0x1   :  { %v30_v0 = vld [vmem:[%s506_s0 + $0x18] sm:$0xff]  ;;  %v29_v1 = vld [vmem:[%s506_s0 + $0x10] sm:$0xff]  ;;  %v28_v3 = vld [vmem:[%s506_s0 + $0x8] sm:$0xff]  ;;  %329 = vset.pattern.permute.xlu0 %v362_v4  ;;  %330 = vset.pattern.permute.xlu1 %v362_v4 }
   0x2   :  { %315 = vmatpush.msra.mxu3 %v30_v0  ;;  %124 = vmatpush.msra.mxu0 %v30_v0  ;;  %v46_v2 = vld [vmem:[%s508_s2 + $0x38] sm:$0xff]  ;;  %v44_v5 = vld [vmem:[%s508_s2 + $0x28] sm:$0xff]  ;;  %v27_v6 = vld [vmem:[%s506_s0] sm:$0xff] }
   0x3   :  { %84 = vperm.xlu0 %329, %v46_v2   ;;  %74 = vperm.xlu1 %330, %v44_v5   ;;  %v35_v7 = vld [vmem:[%s507_s1 + $0x20] sm:$0xff]  ;;  %v42_v9 = vld [vmem:[%s508_s2 + $0x18] sm:$0xff]  ;;  %v45_v10 = vld [vmem:[%s508_s2 + $0x30] sm:$0xff] }
   0x4   :  { %316 = vmatpush.msra.mxu3 %v29_v1  ;;  %125 = vmatpush.msra.mxu0 %v29_v1  ;;  %v31_v8 = vld [vmem:[%s507_s1] sm:$0xff] }
   0x5   :  { %331 = vset.pattern.permute.xlu2 %v362_v4 }
   0x6   :  { %317 = vmatpush.msra.mxu3 %v28_v3  ;;  %126 = vmatpush.msra.mxu0 %v28_v3 }
   0x8   :  { %318 = vmatpush.msra.mxu3 %v27_v6  ;;  %127 = vmatpush.msra.mxu0 %v27_v6 }
   0x9   :  { %305 = vmatmul.msk.f32.vlgmr.msra.gmra.mxu3 %vm87_vm0, %v35_v7 }
   0xa   :  { %12 = vsyncpa [#allocation3], 0  ;;  %301 = vmatmul.msk.f32.vlgmr.msra.gmra.mxu0 %vm87_vm0, %v31_v8  ;;  %v43_v11 = vld [vmem:[%s508_s2 + $0x20] sm:$0xff]  ;;  %64 = vperm.xlu2 %331, %v42_v9   ;;  %v36_v12 = vld [vmem:[%s507_s1 + $0x28] sm:$0xff]  ;;  %vm189_vm1 = vcmask 523264   ;;  %s363_s8 = smov [#allocation2]  }
   0xb   :  { %79 = vperm.xlu0 %329, %v45_v10   ;;  %69 = vperm.xlu1 %330, %v43_v11   ;;  %v32_v13 = vld [vmem:[%s507_s1 + $0x8] sm:$0xff]  ;;  %v41_v14 = vld [vmem:[%s508_s2 + $0x10] sm:$0xff]  ;;  %v39_v16 = vld [vmem:[%s508_s2] sm:$0xff]  ;;  %s292_s11 = sshll.u32 %s513_s7, 4  ;;  %s293_s11 = int_to_ptr.hbm [resolvable:$true] %s292_s11 }
   0xc   :  { %v40_v15 = vld [vmem:[%s508_s2 + $0x8] sm:$0xff]  ;;  %v37_v17 = vld [vmem:[%s507_s1 + $0x30] sm:$0xff]  ;;  %v168_v19 = vld [vmem:[%s510_s4 + $0x18] sm:$0xff] }
   0xd   :  { %v33_v18 = vld [vmem:[%s507_s1 + $0x10] sm:$0xff]  ;;  %v166_v21 = vld [vmem:[%s510_s4 + $0x8] sm:$0xff]  ;;  %v38_v22 = vld [vmem:[%s507_s1 + $0x38] sm:$0xff] }
   0xe   :  { %v167_v20 = vld [vmem:[%s510_s4 + $0x10] sm:$0xff]  ;;  %v34_v23 = vld [vmem:[%s507_s1 + $0x18] sm:$0xff]  ;;  %v165_v24 = vld [vmem:[%s510_s4] sm:$0xff] }
   0xf   :  { %v236_v25 = vld [vmem:[%s512_s6] sm:$0xf]  ;;  %v164_v59 = vld [vmem:[%s509_s3 + $0x18] sm:$0xff]  ;;  %v162_v60 = vld [vmem:[%s509_s3 + $0x8] sm:$0xff] }
  0x10   :  { %v161_v58 = vld [vmem:[%s509_s3] sm:$0xff]  ;;  %v163_v61 = vld [vmem:[%s509_s3 + $0x10] sm:$0xff] }
  0x11   :  { %306 = vmatmul.msk.f32.gmra.mxu3 %vm87_vm0, %v36_v12 }
  0x12   :  { %302 = vmatmul.msk.f32.gmra.mxu0 %vm87_vm0, %v32_v13  ;;  %59 = vperm.xlu2 %331, %v41_v14   ;;  %v235_v14 = vld [vmem:[%s511_s5] sm:$0xf]  ;;  %s290_s5 = sshll.u32 %s363_s8, 4  ;;  %s291_s5 = int_to_ptr.vmem [resolvable:$true] %s290_s5 }
  0x13   :  { %54 = vperm.xlu0 %329, %v40_v15   ;;  %49 = vperm.xlu1 %330, %v39_v16  }
  0x19   :  { %307 = vmatmul.msk.f32.gmra.mxu3 %vm87_vm0, %v37_v17 }
  0x1a   :  { %303 = vmatmul.msk.f32.gmra.mxu0 %vm87_vm0, %v33_v18  ;;  %186 = vperm.xlu2 %331, %v168_v19  }
  0x1b   :  { %181 = vperm.xlu0 %329, %v167_v20   ;;  %176 = vperm.xlu1 %330, %v166_v21  }
  0x21   :  { %308 = vmatmul.msk.f32.gmra.mxu3 %vm87_vm0, %v38_v22 }
  0x22   :  { %304 = vmatmul.msk.f32.gmra.mxu0 %vm87_vm0, %v34_v23  ;;  %171 = vperm.xlu2 %331, %v165_v24  }
  0x23   :  { %239 = vperm.xlu0 %329, %v236_v25  }
  0x64   :  { %v65_v34 = vpop.permute.xlu2 %64 }
  0x6c   :  { %v60_v47 = vpop.permute.xlu2 %59 }
  0x74   :  { %v187_v63 = vpop.permute.xlu2 %186 }
  0x75   :  { %v85_v30 = vpop.permute.xlu0 %84  ;;  %v75_v31 = vpop.permute.xlu1 %74 }
  0x7c   :  { %v172_v9 = vpop.permute.xlu2 %171 }
  0x7d   :  { %v80_v35 = vpop.permute.xlu0 %79  ;;  %v70_v36 = vpop.permute.xlu1 %69 }
  0x85   :  { %v55_v50 = vpop.permute.xlu0 %54  ;;  %v50_v51 = vpop.permute.xlu1 %49 }
  0x87   :  { %v129_v26 = vpop.f32.mrf.mxu0 }
  0x88   :  { %v130_v54 = vadd.f32 %v129_v26, %v50_v51 }
  0x8a   :  { %v153_v57 = vmax.f32 %v130_v54, 0.0 }
  0x8c   :  { %v141_v27 = vpop.f32.mrf.mxu3 }
  0x8d   :  { %v142_v43 = vadd.f32 %v141_v27, %v70_v36  ;;  %v182_v4 = vpop.permute.xlu0 %181  ;;  %v177_v5 = vpop.permute.xlu1 %176 }
  0x8f   :  { %v132_v29 = vpop.f32.mrf.mxu0  ;;  %v157_v48 = vmax.f32 %v142_v43, 0.0 }
  0x90   :  { %v133_v52 = vadd.f32 %v132_v29, %v55_v50 }
  0x92   :  { %v154_v56 = vmax.f32 %v133_v52, 0.0 }
  0x94   :  { %v144_v28 = vpop.f32.mrf.mxu3 }
  0x95   :  { %v145_v40 = vadd.f32 %v144_v28, %v75_v31  ;;  %v240_v15 = vpop.permute.xlu0 %239 }
  0x97   :  { %v135_v33 = vpop.f32.mrf.mxu0  ;;  %v158_v45 = vmax.f32 %v145_v40, 0.0 }
  0x98   :  { %v136_v49 = vadd.f32 %v135_v33, %v60_v47 }
  0x9a   :  { %v155_v55 = vmax.f32 %v136_v49, 0.0 }
  0x9c   :  { %v147_v32 = vpop.f32.mrf.mxu3 }
  0x9d   :  { %v148_v38 = vadd.f32 %v147_v32, %v80_v35 }
  0x9f   :  { %v138_v42 = vpop.f32.mrf.mxu0  ;;  %v159_v44 = vmax.f32 %v148_v38, 0.0 }
  0xa0   :  { %v139_v46 = vadd.f32 %v138_v42, %v65_v34 }
  0xa2   :  { %v156_v53 = vmax.f32 %v139_v46, 0.0 }
  0xa4   :  { %v150_v37 = vpop.f32.mrf.mxu3 }
  0xa5   :  { %v151_v39 = vadd.f32 %v150_v37, %v85_v30 }
  0xa7   :  { %v160_v41 = vmax.f32 %v151_v39, 0.0 }
  0xa9   :  { %210 = vmatpush.msra.mxu1 %v160_v41  ;;  %319 = vmatpush.msra.mxu2 %v160_v41 }
  0xab   :  { %211 = vmatpush.msra.mxu1 %v159_v44  ;;  %320 = vmatpush.msra.mxu2 %v159_v44 }
  0xad   :  { %212 = vmatpush.msra.mxu1 %v158_v45  ;;  %321 = vmatpush.msra.mxu2 %v158_v45 }
  0xaf   :  { %213 = vmatpush.msra.mxu1 %v157_v48  ;;  %322 = vmatpush.msra.mxu2 %v157_v48 }
  0xb1   :  { %214 = vmatpush.msra.mxu1 %v156_v53  ;;  %323 = vmatpush.msra.mxu2 %v156_v53 }
  0xb3   :  { %215 = vmatpush.msra.mxu1 %v155_v55  ;;  %324 = vmatpush.msra.mxu2 %v155_v55 }
  0xb5   :  { %216 = vmatpush.msra.mxu1 %v154_v56  ;;  %325 = vmatpush.msra.mxu2 %v154_v56 }
  0xb7   :  { %217 = vmatpush.msra.mxu1 %v153_v57  ;;  %326 = vmatpush.msra.mxu2 %v153_v57 }
  0xb8   :  { %309 = vmatmul.msk.f32.vlgmr.msra.gmra.mxu1 %vm189_vm1, %v161_v58  ;;  %312 = vmatmul.msk.f32.vlgmr.msra.gmra.mxu2 %vm189_vm1, %v164_v59 }
  0xc0   :  { %310 = vmatmul.msk.f32.gmra.mxu1 %vm189_vm1, %v162_v60 }
  0xc8   :  { %311 = vmatmul.msk.f32.gmra.mxu1 %vm189_vm1, %v163_v61 }
 0x135   :  { %v219_v62 = vpop.f32.mrf.mxu1 }
 0x136   :  { %v220_v10 = vadd.f32 %v219_v62, %v172_v9 }
 0x138   :  { %v231_v13 = vmax.f32 %v220_v10, 0.0 }
 0x13b   :  { %v228_v0 = vpop.f32.mrf.mxu2 }
 0x13c   :  { %v229_v1 = vadd.f32 %v228_v0, %v187_v63 }
 0x13d   :  { %v222_v2 = vpop.f32.mrf.mxu1 }
 0x13e   :  { %v234_v3 = vmax.f32 %v229_v1, 0.0  ;;  %v223_v7 = vadd.f32 %v222_v2, %v177_v5 }
 0x140   :  { %257 = vmatpush.msrb.mxu2 %v234_v3  ;;  %v232_v12 = vmax.f32 %v223_v7, 0.0 }
 0x145   :  { %v225_v6 = vpop.f32.mrf.mxu1 }
 0x146   :  { %v226_v8 = vadd.f32 %v225_v6, %v182_v4 }
 0x148   :  { %v233_v11 = vmax.f32 %v226_v8, 0.0 }
 0x14a   :  { %258 = vmatpush.msrb.mxu2 %v233_v11 }
 0x14c   :  { %259 = vmatpush.msrb.mxu2 %v232_v12 }
 0x14e   :  { %260 = vmatpush.msrb.mxu2 %v231_v13 }
 0x14f   :  { %313 = vmatmul.msk.f32.vlgmr.msrb.gmra.mxu2 %vm87_vm0, %v235_v14 }
 0x1d2   :  { %v262_v16 = vpop.f32.mrf.mxu2 }
 0x1d3   :  { %v263_v17 = vadd.f32 %v262_v16, %v240_v15 }
 0x1d5   :  { %v314_v18 = vmul.f32 -1.442695, %v263_v17 }
 0x1d7   :  { %332 = vpow2.f32 %v314_v18 }
 0x1dd   :  { %v333_v19 = vpop.eup %332 }
 0x1de   :  { %v268_v20 = vadd.f32 1.0, %v333_v19 }
 0x1e0   :  { %334 = vrcp.f32 %v268_v20  ;;  %v280_v24 = vand.u32 2147483648, %v268_v20  ;;  %v278_v26 = vand.u32 2147483647, %v268_v20  ;;  %vm274_vm3 = vweird.f32 %v268_v20 }
 0x1e2   :  { %v281_v28 = vor.u32 1.1754944e-38, %v280_v24  ;;  %vm279_vm5 = vcmp.eq.f32.partialorder %v278_v26, 8.507059e+37 }
 0x1e6   :  { %v335_v21 = vpop.eup %334 }
 0x1e7   :  { %v270_v22 = vmul.f32 %v335_v21, %v268_v20  ;;  %vm275_vm2 = vweird.f32 %v335_v21 }
 0x1e8   :  { %vm276_vm4 = vmor %vm274_vm3, %vm275_vm2 }
 0x1e9   :  { %v271_v23 = vsub.f32 1.0, %v270_v22 }
 0x1eb   :  { %v272_v25 = vmul.f32 %v335_v21, %v271_v23 }
 0x1ed   :  { %v273_v27 = vadd.f32 %v335_v21, %v272_v25 }
 0x1ef   :  { %v277_v29 = vsel %vm276_vm4, %v335_v21, %v273_v27 }
 0x1f0   :  { %v282_v30 = vsel %vm279_vm5, %v281_v28, %v277_v29 }
 0x1f1   :  { %284 = vst [vmem:[#allocation2] sm:$0xf] %v282_v30 }
 0x1f2   :  { %295 = dma.vmem_to_hbm [thread:$0]  %s291_s5, 64, %s293_s11, [#allocation3]  }
 0x1f3   :  { %360 = dma.done.wait [#allocation3], 64  }
 0x1f4   :  { %361 = vsyncadd [#allocation3], 4294967232 }
 0x1f5   :  { %300 = vsyncpa [#allocation3], 1 }

</bundles_post_ra>
